<compile_context>
chip_gen: v7x
topology: tpu7x:2x2x1
jax: 0.10.0
libtpu: 0.0.40
codegen_flags: <defaults>
</compile_context>

<pallas_src>
import functools
import math

import jax
import jax.numpy as jnp
from jax.experimental import pallas as pl
from jax.experimental.pallas import tpu as pltpu


def _round_up(x, m):
    return ((x + m - 1) // m) * m


def _ll_kernel(theta_ref, x_ref, wmu_ref, wnls_ref, bmu_ref, bnls_ref, red_ref,
               u_ref, ll_ref, *, const):
    """Lane-dense, q-grouped tiles (q consecutive batch rows share one VMEM row).

    theta_ref : (rb, q*C)    x_ref  : (rb, q*D)
    wmu_ref   : (q*C, q*D)   block-diag, q copies of W_mu
    wnls_ref  : (q*C, q*D)   block-diag, q copies of -W_s
    bmu_ref   : (1, q*D)     tiled b_mu
    bnls_ref  : (1, q*D)     tiled -b_s
    red_ref   : (q*D, q)     0/1 segmented-sum matrix (sums each group of D lanes)
    u_ref     : (rb, q*D)    ll_ref : (rb, q)
    """
    a = theta_ref[...]                                                   # (rb, qC)

    # Conditional affine projection in the x-interleaved lane layout.
    mu = jnp.dot(a, wmu_ref[...], preferred_element_type=jnp.float32) + bmu_ref[...]
    nls = jnp.dot(a, wnls_ref[...], preferred_element_type=jnp.float32) + bnls_ref[...]

    u = (x_ref[...] - mu) * jnp.exp(nls)                                 # (rb, qD)
    u_ref[...] = u

    # Per-element log-density contribution: -0.5*u^2 - log_sigma = nls - 0.5*u^2.
    t = nls - 0.5 * (u * u)
    # Segmented sum over each row's D features -> lane-dense (rb, q) block.
    ll_ref[...] = jnp.dot(t, red_ref[...], preferred_element_type=jnp.float32) + const


def _choose_row_block(n_rows, q, target_rows):
    """Pick the grouped-row block size: big tiles, but >=~8 tiles when possible."""
    rb_cap = max(8, target_rows // q)      # per-step size target (~0.5 MB of data)
    rb_floor = max(8, 1024 // q)           # never drop below ~1K batch rows/step
    rb = _round_up(pl.cdiv(n_rows, 8), 8)  # aim for ~8 tiles (v7x: 2 TensorCores)
    rb = max(rb_floor, min(rb_cap, rb))
    if rb >= n_rows:
        return n_rows, 1                   # single full-extent block
    return rb, pl.cdiv(n_rows, rb)


@functools.partial(jax.jit, static_argnames=("target_rows",))
def log_likelihood(theta, x, w_mu, b_mu, w_s, b_s, *, target_rows=8192):
    """Returns (u, log_likelihood) exactly as BaseConditionalFlow.log_likelihood."""
    theta = jnp.asarray(theta, jnp.float32)
    x = jnp.asarray(x, jnp.float32)
    B, C = theta.shape
    D = x.shape[1]

    # Row-group size q: largest of {32, 16, 8} dividing B (keeps the wrapper
    # reshapes free); only pad the batch if B is not a multiple of 8.
    q = next((g for g in (32, 16, 8) if B % g == 0), None)
    if q is None:
        q = 32
        pad = (-B) % q
        theta = jnp.pad(theta, ((0, pad), (0, 0)))
        x = jnp.pad(x, ((0, pad), (0, 0)))
    else:
        pad = 0
    Bp = B + pad
    R = Bp // q                                   # grouped rows

    # Free, contiguous (bitcast) reshapes — no transposes, no extra HBM passes.
    theta2 = theta.reshape(R, q * C)
    x2 = x.reshape(R, q * D)

    # One-time parameter transforms (block-diagonal weights, tiled biases).
    w_mu = jnp.asarray(w_mu, jnp.float32).reshape(C, D)
    w_s = jnp.asarray(w_s, jnp.float32).reshape(C, D)
    b_mu = jnp.asarray(b_mu, jnp.float32).reshape(1, D)
    b_s = jnp.asarray(b_s, jnp.float32).reshape(1, D)

    eye_q = jnp.eye(q, dtype=jnp.float32)
    wmu_bd = jnp.kron(eye_q, w_mu)                        # (qC, qD)
    wnls_bd = jnp.kron(eye_q, -w_s)                       # (qC, qD), negated fold
    bmu_t = jnp.tile(b_mu, (1, q))                        # (1, qD)
    bnls_t = jnp.tile(-b_s, (1, q))                       # (1, qD)
    red = jnp.kron(eye_q, jnp.ones((D, 1), jnp.float32))  # (qD, q)

    const = float(-0.5 * D * math.log(2.0 * math.pi))

    rb, n_tiles = _choose_row_block(R, q, int(target_rows))

    flops = int(2 * R * (q * C) * (q * D) * 2        # two block-diag projections
                + 2 * R * (q * D) * q                # segmented-sum reduction
                + 8 * Bp * D)                        # elementwise
    bytes_accessed = int(4 * (Bp * C + 2 * Bp * D + Bp)
                         + 4 * (2 * (q * C) * (q * D) + (q * D) * q + 2 * q * D))

    u2, ll2 = pl.pallas_call(
        functools.partial(_ll_kernel, const=const),
        out_shape=(
            jax.ShapeDtypeStruct((R, q * D), jnp.float32),   # u (grouped rows)
            jax.ShapeDtypeStruct((R, q), jnp.float32),       # log-likelihood
        ),
        grid=(n_tiles,),
        in_specs=[
            pl.BlockSpec((rb, q * C), lambda i: (i, 0)),      # theta tile
            pl.BlockSpec((rb, q * D), lambda i: (i, 0)),      # x tile
            pl.BlockSpec((q * C, q * D), lambda i: (0, 0)),   # W_mu (resident)
            pl.BlockSpec((q * C, q * D), lambda i: (0, 0)),   # -W_s (resident)
            pl.BlockSpec((1, q * D), lambda i: (0, 0)),       # b_mu (resident)
            pl.BlockSpec((1, q * D), lambda i: (0, 0)),       # -b_s (resident)
            pl.BlockSpec((q * D, q), lambda i: (0, 0)),       # reduce matrix
        ],
        out_specs=(
            pl.BlockSpec((rb, q * D), lambda i: (i, 0)),
            pl.BlockSpec((rb, q), lambda i: (i, 0)),
        ),
        compiler_params=pltpu.CompilerParams(
            dimension_semantics=("parallel",),
        ),
        cost_estimate=pl.CostEstimate(
            flops=flops,
            transcendentals=int(Bp * D),
            bytes_accessed=bytes_accessed,
        ),
    )(theta2, x2, wmu_bd, wnls_bd, bmu_t, bnls_t, red)

    # Free reshapes back to the natural interface; slice only if we padded.
    u = u2.reshape(Bp, D)[:B]
    ll = ll2.reshape(Bp)[:B]
    return u, ll


def _reference(theta, x, w_mu, b_mu, w_s, b_s):
    hp = jax.lax.Precision.HIGHEST
    mu = jnp.dot(theta, w_mu, precision=hp) + b_mu
    log_sigma = jnp.dot(theta, w_s, precision=hp) + b_s
    u = (x - mu) * jnp.exp(-log_sigma)
    logdet = -jnp.sum(log_sigma, axis=1)
    D = x.shape[1]
    const = -0.5 * D * math.log(2.0 * math.pi)
    ll = const - 0.5 * jnp.sum(u ** 2, axis=1) + logdet
    return u, ll


if __name__ == "__main__":
    B = 64                # batch (multiple of 32 -> no padding, q=32 path)
    n_conditionals = 6    # theta dim
    n_inputs = 5          # x dim

    key = jax.random.PRNGKey(0)
    k_theta, k_x, k_wm, k_bm, k_ws, k_bs = jax.random.split(key, 6)

    theta = jax.random.normal(k_theta, (B, n_conditionals), dtype=jnp.float32)
    x = jax.random.normal(k_x, (B, n_inputs), dtype=jnp.float32)

    # Deterministic parameter init for the concrete conditional affine flow.
    w_mu = 0.1 * jax.random.normal(k_wm, (n_conditionals, n_inputs), dtype=jnp.float32)
    b_mu = 0.1 * jax.random.normal(k_bm, (1, n_inputs), dtype=jnp.float32)
    w_s = 0.1 * jax.random.normal(k_ws, (n_conditionals, n_inputs), dtype=jnp.float32)
    b_s = 0.1 * jax.random.normal(k_bs, (1, n_inputs), dtype=jnp.float32)

    u, ll = log_likelihood(theta, x, w_mu, b_mu, w_s, b_s)
    jax.block_until_ready((u, ll))

    u_ref, ll_ref = _reference(theta, x, w_mu, b_mu, w_s, b_s)
    assert u.shape == (B, n_inputs) and ll.shape == (B,)
    # Tolerance allows for the MXU's multi-pass f32 matmul path.
    assert bool(jnp.allclose(u, u_ref, atol=5e-3, rtol=5e-3))
    assert bool(jnp.allclose(ll, ll_ref, atol=5e-3, rtol=5e-3))

    print("KERNEL_OK")
</pallas_src>

<mosaic_0001>
module attributes {stable_mosaic.version = 11 : i64} {
  func.func @_ll_kernel(%arg0: i32, %arg1: memref<2x192xf32, #tpu.memory_space<vmem>>, %arg2: memref<2x160xf32, #tpu.memory_space<vmem>>, %arg3: memref<192x160xf32, #tpu.memory_space<vmem>>, %arg4: memref<192x160xf32, #tpu.memory_space<vmem>>, %arg5: memref<1x160xf32, #tpu.memory_space<vmem>>, %arg6: memref<1x160xf32, #tpu.memory_space<vmem>>, %arg7: memref<160x32xf32, #tpu.memory_space<vmem>>, %arg8: memref<2x160xf32, #tpu.memory_space<vmem>>, %arg9: memref<2x32xf32, #tpu.memory_space<vmem>>) attributes {dimension_semantics = [#tpu.dimension_semantics<parallel>], iteration_bounds = array<i64: 1>, scalar_prefetch = 0 : i64, scratch_operands = 0 : i64, tpu.core_type = #tpu.core_type<tc>, window_params = [{transform_indices = @transform_0, window_bounds = array<i64: 2, 192>}, {transform_indices = @transform_1, window_bounds = array<i64: 2, 160>}, {pipeline_mode = #tpu.pipeline_mode<synchronous>, transform_indices = @transform_2, window_bounds = array<i64: 192, 160>}, {pipeline_mode = #tpu.pipeline_mode<synchronous>, transform_indices = @transform_3, window_bounds = array<i64: 192, 160>}, {pipeline_mode = #tpu.pipeline_mode<synchronous>, transform_indices = @transform_4, window_bounds = array<i64: 1, 160>}, {pipeline_mode = #tpu.pipeline_mode<synchronous>, transform_indices = @transform_5, window_bounds = array<i64: 1, 160>}, {pipeline_mode = #tpu.pipeline_mode<synchronous>, transform_indices = @transform_6, window_bounds = array<i64: 160, 32>}, {transform_indices = @transform_7, window_bounds = array<i64: 2, 160>}, {transform_indices = @transform_8, window_bounds = array<i64: 2, 32>}]} {
    %c0 = arith.constant 0 : index
    %c0_0 = arith.constant 0 : index
    %0 = vector.load %arg1[%c0, %c0_0] : memref<2x192xf32, #tpu.memory_space<vmem>>, vector<2x192xf32>
    %c0_1 = arith.constant 0 : index
    %c0_2 = arith.constant 0 : index
    %1 = vector.load %arg3[%c0_1, %c0_2] : memref<192x160xf32, #tpu.memory_space<vmem>>, vector<192x160xf32>
    %cst = arith.constant dense<0.000000e+00> : vector<2x160xf32>
    %2 = tpu.matmul %0, %1, %cst {dimension_numbers = #tpu.dot_dimension_numbers<[1], [0], [0], [1], [0, 0, 1, 1], [], []>} : vector<2x192xf32>, vector<192x160xf32>, vector<2x160xf32> -> vector<2x160xf32>
    %c0_3 = arith.constant 0 : index
    %c0_4 = arith.constant 0 : index
    %3 = vector.load %arg5[%c0_3, %c0_4] : memref<1x160xf32, #tpu.memory_space<vmem>>, vector<1x160xf32>
    %4 = vector.broadcast %3 : vector<1x160xf32> to vector<2x160xf32>
    %5 = arith.addf %2, %4 : vector<2x160xf32>
    %c0_5 = arith.constant 0 : index
    %c0_6 = arith.constant 0 : index
    %6 = vector.load %arg4[%c0_5, %c0_6] : memref<192x160xf32, #tpu.memory_space<vmem>>, vector<192x160xf32>
    %cst_7 = arith.constant dense<0.000000e+00> : vector<2x160xf32>
    %7 = tpu.matmul %0, %6, %cst_7 {dimension_numbers = #tpu.dot_dimension_numbers<[1], [0], [0], [1], [0, 0, 1, 1], [], []>} : vector<2x192xf32>, vector<192x160xf32>, vector<2x160xf32> -> vector<2x160xf32>
    %c0_8 = arith.constant 0 : index
    %c0_9 = arith.constant 0 : index
    %8 = vector.load %arg6[%c0_8, %c0_9] : memref<1x160xf32, #tpu.memory_space<vmem>>, vector<1x160xf32>
    %9 = vector.broadcast %8 : vector<1x160xf32> to vector<2x160xf32>
    %10 = arith.addf %7, %9 : vector<2x160xf32>
    %c0_10 = arith.constant 0 : index
    %c0_11 = arith.constant 0 : index
    %11 = vector.load %arg2[%c0_10, %c0_11] : memref<2x160xf32, #tpu.memory_space<vmem>>, vector<2x160xf32>
    %12 = arith.subf %11, %5 : vector<2x160xf32>
    %13 = math.exp %10 : vector<2x160xf32>
    %14 = arith.mulf %12, %13 : vector<2x160xf32>
    %c0_12 = arith.constant 0 : index
    %c0_13 = arith.constant 0 : index
    %15 = vector.load %arg8[%c0_12, %c0_13] : memref<2x160xf32, #tpu.memory_space<vmem>>, vector<2x160xf32>
    tpu.vector_store %arg8[%c0_12, %c0_13], %14 {strides = array<i32>} : memref<2x160xf32, #tpu.memory_space<vmem>>, vector<2x160xf32>,
    %16 = arith.mulf %14, %14 : vector<2x160xf32>
    %cst_14 = arith.constant 5.000000e-01 : f32
    %17 = vector.broadcast %cst_14 : f32 to vector<2x160xf32>
    %18 = arith.mulf %17, %16 : vector<2x160xf32>
    %19 = arith.subf %10, %18 : vector<2x160xf32>
    %c0_15 = arith.constant 0 : index
    %c0_16 = arith.constant 0 : index
    %20 = vector.load %arg7[%c0_15, %c0_16] : memref<160x32xf32, #tpu.memory_space<vmem>>, vector<160x32xf32>
    %cst_17 = arith.constant dense<0.000000e+00> : vector<2x32xf32>
    %21 = tpu.matmul %19, %20, %cst_17 {dimension_numbers = #tpu.dot_dimension_numbers<[1], [0], [0], [1], [0, 0, 1, 1], [], []>} : vector<2x160xf32>, vector<160x32xf32>, vector<2x32xf32> -> vector<2x32xf32>
    %cst_18 = arith.constant -4.59469271 : f32
    %22 = vector.broadcast %cst_18 : f32 to vector<2x32xf32>
    %23 = arith.addf %21, %22 : vector<2x32xf32>
    %c0_19 = arith.constant 0 : index
    %c0_20 = arith.constant 0 : index
    %24 = vector.load %arg9[%c0_19, %c0_20] : memref<2x32xf32, #tpu.memory_space<vmem>>, vector<2x32xf32>
    tpu.vector_store %arg9[%c0_19, %c0_20], %23 {strides = array<i32>} : memref<2x32xf32, #tpu.memory_space<vmem>>, vector<2x32xf32>,
    return
  }
  func.func @transform_0(%arg0: i32) -> (i32, i32) {
    %c0_i32 = arith.constant 0 : i32
    %c0_i32_0 = arith.constant 0 : i32
    return %arg0, %c0_i32 : i32, i32
  }
  func.func @transform_1(%arg0: i32) -> (i32, i32) {
    %c0_i32 = arith.constant 0 : i32
    %c0_i32_0 = arith.constant 0 : i32
    return %arg0, %c0_i32 : i32, i32
  }
  func.func @transform_2(%arg0: i32) -> (i32, i32) {
    %c0_i32 = arith.constant 0 : i32
    %c0_i32_0 = arith.constant 0 : i32
    %c0_i32_1 = arith.constant 0 : i32
    return %c0_i32, %c0_i32_0 : i32, i32
  }
  func.func @transform_3(%arg0: i32) -> (i32, i32) {
    %c0_i32 = arith.constant 0 : i32
    %c0_i32_0 = arith.constant 0 : i32
    %c0_i32_1 = arith.constant 0 : i32
    return %c0_i32, %c0_i32_0 : i32, i32
  }
  func.func @transform_4(%arg0: i32) -> (i32, i32) {
    %c0_i32 = arith.constant 0 : i32
    %c0_i32_0 = arith.constant 0 : i32
    %c0_i32_1 = arith.constant 0 : i32
    return %c0_i32, %c0_i32_0 : i32, i32
  }
  func.func @transform_5(%arg0: i32) -> (i32, i32) {
    %c0_i32 = arith.constant 0 : i32
    %c0_i32_0 = arith.constant 0 : i32
    %c0_i32_1 = arith.constant 0 : i32
    return %c0_i32, %c0_i32_0 : i32, i32
  }
  func.func @transform_6(%arg0: i32) -> (i32, i32) {
    %c0_i32 = arith.constant 0 : i32
    %c0_i32_0 = arith.constant 0 : i32
    %c0_i32_1 = arith.constant 0 : i32
    return %c0_i32, %c0_i32_0 : i32, i32
  }
  func.func @transform_7(%arg0: i32) -> (i32, i32) {
    %c0_i32 = arith.constant 0 : i32
    %c0_i32_0 = arith.constant 0 : i32
    return %arg0, %c0_i32 : i32, i32
  }
  func.func @transform_8(%arg0: i32) -> (i32, i32) {
    %c0_i32 = arith.constant 0 : i32
    %c0_i32_0 = arith.constant 0 : i32
    return %arg0, %c0_i32 : i32, i32
  }
}

</mosaic_0001>

<bundles_post_ra>
// kernel: neg.2
= control target key start
LH: loop header
LB: loop body
LE: loop exit
PB: predicated region body
PF: predicated region fallthrough
CT: control target
= control target key end

     0   :  { %2 = vsyncpa [#allocation1], 0  ;;  %s44_s6 = smov [#allocation0]   ;;  %s70_s0 = inlined_call_operand.hbm [shape: f32[6,5], index: 0, kind: input, shape index: {}]   ;;  %s71_s1 = inlined_call_operand.vmem [shape: f32[6,5], index: 1, kind: output, shape index: {}]  }
   0x1   :  { %s7_s7 = sshll.u32 %s44_s6, 4  ;;  %s20_s10 = scalar_lea.hbm %s70_s0, 128  ;;  %s8_s7 = int_to_ptr.vmem [resolvable:$true] %s7_s7 }
   0x2   :  { %p21_p0 = scmp.ne.s32.totalorder %s70_s0, %s20_s10  ;;  %p24_p1 = scmp.lt.u32.totalorder %s20_s10, %s70_s0 }
   0x4   :  { %p26_p2 = pnand %p24_p1, %p21_p0 }
   0x6   :  { %29 = shalt.err (!%p26_p2)
}
   0x7   :  { %s30_s15 = scalar_lea.vmem %s8_s7, 128  ;;  %p35_p4 = scmp.lt.s32.totalorder %s8_s7, %s8_s7 }
   0x8   :  { %p31_p3 = scmp.ne.s32.totalorder %s8_s7, %s30_s15  ;;  %p36_p5 = scmp.lt.s32.totalorder %s30_s15, %s30_s15 }
   0xa   :  { %p37_p6 = por %p36_p5, %p35_p4 }
   0xc   :  { %p38_p7 = pnand %p37_p6, %p31_p3 }
   0xe   :  { %41 = shalt.err (!%p38_p7)
}
   0xf   :  { %10 = dma.hbm_to_vmem [thread:$0]  %s70_s0, 128, %s8_s7, [#allocation1]  }
  0x10   :  { %42 = dma.done.wait [#allocation1], 128  }
  0x11   :  { %43 = vsyncadd [#allocation1], 4294967168  ;;  %v12_v0 = vld [vmem:[#allocation0] sm:$0x3f] }
  0x12   :  { %v15_v1 = vxor.u32 2147483648, %v12_v0 }
  0x14   :  { %17 = vst [vmem:[%s71_s1] sm:$0xff] %v15_v1 }
  0x15   :  { %18 = vsyncpa [#allocation1], 1 }

</bundles_post_ra>
